<compile_context>
chip_gen: v5e
topology: v5e:2x2
jax: 0.10.0
libtpu: 0.0.40
codegen_flags: <defaults>
</compile_context>

<pallas_src>
import jax
import jax.numpy as jnp
from jax import lax
from jax.experimental import pallas as pl
from jax.experimental.pallas import tpu as pltpu


def fcnn_kernel(x_ref, w1_ref, w2_ref, ot_ref):
    # x_ref : (tm, dim_in)          f32   natural PyTorch activation layout
    # w1_ref: (dim_hidden, dim_in)  f32   PyTorch nn.Linear weight layout
    # w2_ref: (dim_out, dim_hidden) f32   PyTorch nn.Linear weight layout
    # ot_ref: (dim_out, tm)         bf16  out^T tile (batch on lanes -> dense stores)
    x_b = x_ref[...].astype(jnp.bfloat16)     # in-kernel cast: VPU has slack
    w1_b = w1_ref[...].astype(jnp.bfloat16)

    # h^T = W1 @ x^T : contract the dim_in axes of both operands.  The batch
    # dimension lands on the lane axis of the result; the implied transpose of
    # the x tile lowers to the XLU, which is idle in this kernel.
    ht = lax.dot_general(
        w1_b, x_b,
        dimension_numbers=(((1,), (1,)), ((), ())),
        preferred_element_type=jnp.float32)    # (dim_hidden, tm), f32 acc on MXU

    ht = jnp.tanh(ht)                          # f32 on EUP (v5e has no bf16 EUP)

    # out^T = W2 @ h^T.  Keep h in f32 (no extra bf16 copy); the 8x32 MXU work
    # is nowhere near binding at f32 rate.
    ot = jnp.dot(w2_ref[...], ht, preferred_element_type=jnp.float32)  # (dim_out, tm)
    ot_ref[...] = ot.astype(ot_ref.dtype)


# Largest batch tile per grid step (multiple of 128).  ~2 MiB VMEM/step.
_TM_MAX = 8192


def _pick_tm(B):
    if B <= _TM_MAX:
        # Single grid step; block == full array, so no (8,128) divisibility
        # constraint applies and no padding is ever needed (any B works).
        return B
    # Multi-step: multiple of 128 keeps the out^T stores lane-dense; the
    # ragged last block (if B % tm != 0) is clipped by Pallas on writeback.
    return _TM_MAX


def fcnn_forward(x, w1, w2, *, tm=None):
    """FCNN forward: tanh(x @ W1^T) @ W2^T  (both Linear layers bias-free).

    x  : (B, dim_in)              float32 (or bf16)
    w1 : (dim_hidden, dim_in)     PyTorch nn.Linear weight layout
    w2 : (dim_out, dim_hidden)    PyTorch nn.Linear weight layout
    returns (B, dim_out) in x.dtype
    """
    B, dim_in = x.shape
    dim_hidden = w1.shape[0]
    dim_out = w2.shape[0]
    if tm is None:
        tm = _pick_tm(B)
    num_blocks = pl.cdiv(B, tm)

    out_t = pl.pallas_call(
        fcnn_kernel,
        out_shape=jax.ShapeDtypeStruct((dim_out, B), jnp.bfloat16),
        grid=(num_blocks,),
        in_specs=[
            # x: natural (B, dim_in) layout, batch-tiled along the first axis.
            pl.BlockSpec((tm, dim_in), lambda i: (i, 0)),
            # Weights: constant index_map -> VMEM-resident across grid steps.
            pl.BlockSpec((dim_hidden, dim_in), lambda i: (0, 0)),
            pl.BlockSpec((dim_out, dim_hidden), lambda i: (0, 0)),
        ],
        # out^T: batch on the lane axis -> unmasked (lane-dense) stores.
        out_specs=pl.BlockSpec((dim_out, tm), lambda i: (0, i)),
        compiler_params=pltpu.CompilerParams(
            dimension_semantics=("parallel",)),   # shards steps across TCs (v7x)
    )(x, w1, w2)

    # Back to PyTorch (B, dim_out) layout and the caller's dtype (one tiny op).
    return out_t.T.astype(x.dtype)


if __name__ == "__main__":
    # Module hyperparameters, consistent with FCNN(dim_in, dim_out, dim_hidden).
    dim_in, dim_out, dim_hidden = 16, 8, 32

    key = jax.random.PRNGKey(0)
    kx, k1, k2 = jax.random.split(key, 3)

    # PyTorch nn.Linear convention: W1 (dim_hidden, dim_in), W2 (dim_out, dim_hidden).
    w1 = jax.random.normal(k1, (dim_hidden, dim_in), dtype=jnp.float32) * 0.1
    w2 = jax.random.normal(k2, (dim_out, dim_hidden), dtype=jnp.float32) * 0.1

    # Main check: lane-dense batch (multiple of 128) -> single grid step.
    batch = 256
    x = jax.random.normal(kx, (batch, dim_in), dtype=jnp.float32)
    out = jax.block_until_ready(fcnn_forward(x, w1, w2))
    ref = jnp.tanh(x @ w1.T) @ w2.T
    assert out.shape == (batch, dim_out)
    # bf16 first-dot inputs + bf16 output -> loosened tolerance vs f32 reference.
    assert jnp.allclose(out, ref, atol=2e-2, rtol=2e-2), "mismatch vs reference"

    # Secondary check: ragged batch (not a multiple of 8 or 128) needs no padding,
    # since the single block equals the full array.
    xr = jax.random.normal(kx, (33, dim_in), dtype=jnp.float32)
    outr = jax.block_until_ready(fcnn_forward(xr, w1, w2))
    refr = jnp.tanh(xr @ w1.T) @ w2.T
    assert outr.shape == (33, dim_out)
    assert jnp.allclose(outr, refr, atol=2e-2, rtol=2e-2), "ragged-batch mismatch"

    print("KERNEL_OK")
</pallas_src>

<mosaic_0001>
module attributes {stable_mosaic.version = 11 : i64} {
  func.func @fcnn_kernel(%arg0: i32, %arg1: memref<256x16xf32, #tpu.memory_space<vmem>>, %arg2: memref<32x16xf32, #tpu.memory_space<vmem>>, %arg3: memref<8x32xf32, #tpu.memory_space<vmem>>, %arg4: memref<8x256xbf16, #tpu.memory_space<vmem>>) attributes {dimension_semantics = [#tpu.dimension_semantics<parallel>], iteration_bounds = array<i64: 1>, scalar_prefetch = 0 : i64, scratch_operands = 0 : i64, tpu.core_type = #tpu.core_type<tc>, window_params = [{transform_indices = @transform_0, window_bounds = array<i64: 256, 16>}, {pipeline_mode = #tpu.pipeline_mode<synchronous>, transform_indices = @transform_1, window_bounds = array<i64: 32, 16>}, {pipeline_mode = #tpu.pipeline_mode<synchronous>, transform_indices = @transform_2, window_bounds = array<i64: 8, 32>}, {transform_indices = @transform_3, window_bounds = array<i64: 8, 256>}]} {
    %c0 = arith.constant 0 : index
    %c0_0 = arith.constant 0 : index
    %0 = vector.load %arg1[%c0, %c0_0] : memref<256x16xf32, #tpu.memory_space<vmem>>, vector<256x16xf32>
    %1 = arith.truncf %0 : vector<256x16xf32> to vector<256x16xbf16>
    %c0_1 = arith.constant 0 : index
    %c0_2 = arith.constant 0 : index
    %2 = vector.load %arg2[%c0_1, %c0_2] : memref<32x16xf32, #tpu.memory_space<vmem>>, vector<32x16xf32>
    %3 = arith.truncf %2 : vector<32x16xf32> to vector<32x16xbf16>
    %cst = arith.constant dense<0.000000e+00> : vector<32x256xf32>
    %4 = tpu.matmul %3, %1, %cst {dimension_numbers = #tpu.dot_dimension_numbers<[1], [1], [0], [0], [0, 0, 1, 0], [], []>} : vector<32x16xbf16>, vector<256x16xbf16>, vector<32x256xf32> -> vector<32x256xf32>
    %5 = math.tanh %4 : vector<32x256xf32>
    %c0_3 = arith.constant 0 : index
    %c0_4 = arith.constant 0 : index
    %6 = vector.load %arg3[%c0_3, %c0_4] : memref<8x32xf32, #tpu.memory_space<vmem>>, vector<8x32xf32>
    %cst_5 = arith.constant dense<0.000000e+00> : vector<8x256xf32>
    %7 = tpu.matmul %6, %5, %cst_5 {dimension_numbers = #tpu.dot_dimension_numbers<[1], [0], [0], [1], [0, 0, 1, 1], [], []>} : vector<8x32xf32>, vector<32x256xf32>, vector<8x256xf32> -> vector<8x256xf32>
    %8 = arith.truncf %7 : vector<8x256xf32> to vector<8x256xbf16>
    %c0_6 = arith.constant 0 : index
    %c0_7 = arith.constant 0 : index
    %9 = vector.load %arg4[%c0_6, %c0_7] : memref<8x256xbf16, #tpu.memory_space<vmem>>, vector<8x256xbf16>
    tpu.vector_store %arg4[%c0_6, %c0_7], %8 {strides = array<i32>} : memref<8x256xbf16, #tpu.memory_space<vmem>>, vector<8x256xbf16>,
    return
  }
  func.func @transform_0(%arg0: i32) -> (i32, i32) {
    %c0_i32 = arith.constant 0 : i32
    %c0_i32_0 = arith.constant 0 : i32
    return %arg0, %c0_i32 : i32, i32
  }
  func.func @transform_1(%arg0: i32) -> (i32, i32) {
    %c0_i32 = arith.constant 0 : i32
    %c0_i32_0 = arith.constant 0 : i32
    %c0_i32_1 = arith.constant 0 : i32
    return %c0_i32, %c0_i32_0 : i32, i32
  }
  func.func @transform_2(%arg0: i32) -> (i32, i32) {
    %c0_i32 = arith.constant 0 : i32
    %c0_i32_0 = arith.constant 0 : i32
    %c0_i32_1 = arith.constant 0 : i32
    return %c0_i32, %c0_i32_0 : i32, i32
  }
  func.func @transform_3(%arg0: i32) -> (i32, i32) {
    %c0_i32 = arith.constant 0 : i32
    %c0_i32_0 = arith.constant 0 : i32
    return %c0_i32, %arg0 : i32, i32
  }
}

</mosaic_0001>

<bundles_post_ra>
// kernel: tpu_custom_call.1
= control target key start
LH: loop header
LB: loop body
LE: loop exit
PB: predicated region body
PF: predicated region fallthrough
CT: control target
= control target key end

     0   :  { %vm69_vm0 = vcmask 130048   ;;  %s453_s0 = inlined_call_operand.vmem [shape: f32[256,16], index: 0, kind: input, shape index: {}]   ;;  %s454_s1 = inlined_call_operand.vmem [shape: f32[32,16], index: 1, kind: input, shape index: {}]   ;;  %s455_s2 = inlined_call_operand.vmem [shape: f32[8,32], index: 2, kind: input, shape index: {}]   ;;  %s456_s3 = inlined_call_operand.hbm [shape: bf16[8,256], index: 3, kind: output, shape index: {}]  }
   0x1   :  { %v29_v0 = vld [vmem:[%s453_s0 + $0x70] sm:$0xff]  ;;  %v30_v1 = vld [vmem:[%s453_s0 + $0x78] sm:$0xff]  ;;  %v27_v6 = vld [vmem:[%s453_s0 + $0x60] sm:$0xff] }
   0x2   :  { %v45_v2 = vld [vmem:[%s453_s0 + $0xf0] sm:$0xff]  ;;  %v54_v3 = vpack.c.bf16 %v30_v1, %v29_v0  ;;  %v46_v4 = vld [vmem:[%s453_s0 + $0xf8] sm:$0xff]  ;;  %v28_v7 = vld [vmem:[%s453_s0 + $0x68] sm:$0xff] }
   0x3   :  { %v62_v5 = vpack.c.bf16 %v46_v4, %v45_v2  ;;  %v43_v9 = vld [vmem:[%s453_s0 + $0xe0] sm:$0xff]  ;;  %v44_v10 = vld [vmem:[%s453_s0 + $0xe8] sm:$0xff]  ;;  %v53_v12 = vpack.c.bf16 %v28_v7, %v27_v6 }
   0x4   :  { %v98_v8 = vsel %vm69_vm0, %v54_v3, 0  ;;  %v61_v13 = vpack.c.bf16 %v44_v10, %v43_v9 }
   0x5   :  { %239 = vmatpush.bf16.xpose.msra.mxu2 %v98_v8  ;;  %v122_v11 = vsel %vm69_vm0, %v62_v5, 0  ;;  %124 = vmatpush.bf16.xpose.msra.mxu0 %v98_v8 }
   0x6   :  { %247 = vmatpush.bf16.xpose.msra.mxu3 %v122_v11  ;;  %143 = vmatpush.bf16.xpose.msra.mxu1 %v122_v11 }
   0x7   :  { %8 = vsyncpa [#allocation3], 0  ;;  %v95_v14 = vsel %vm69_vm0, %v53_v12, 0  ;;  %v119_v15 = vsel %vm69_vm0, %v61_v13, 0  ;;  %v25_v16 = vld [vmem:[%s453_s0 + $0x50] sm:$0xff]  ;;  %v26_v17 = vld [vmem:[%s453_s0 + $0x58] sm:$0xff] }
   0x8   :  { %v41_v18 = vld [vmem:[%s453_s0 + $0xd0] sm:$0xff]  ;;  %v42_v19 = vld [vmem:[%s453_s0 + $0xd8] sm:$0xff]  ;;  %v52_v20 = vpack.c.bf16 %v26_v17, %v25_v16  ;;  %v23_v24 = vld [vmem:[%s453_s0 + $0x40] sm:$0xff]  ;;  %vm171_vm1 = vcmask 261120   ;;  %s298_s30 = smov [#allocation2]   ;;  %s224_s7 = sshll.u32 %s456_s3, 4  ;;  %s225_s7 = int_to_ptr.hbm [resolvable:$true] %s224_s7 }
   0x9   :  { %v60_v21 = vpack.c.bf16 %v42_v19, %v41_v18  ;;  %v24_v25 = vld [vmem:[%s453_s0 + $0x48] sm:$0xff]  ;;  %v39_v26 = vld [vmem:[%s453_s0 + $0xc0] sm:$0xff]  ;;  %v21_v32 = vld [vmem:[%s453_s0 + $0x30] sm:$0xff]  ;;  %s222_s4 = sshll.u32 %s298_s30, 4  ;;  %s223_s4 = int_to_ptr.vmem [resolvable:$true] %s222_s4 }
   0xa   :  { %v92_v22 = vsel %vm69_vm0, %v52_v20, 0  ;;  %v40_v27 = vld [vmem:[%s453_s0 + $0xc8] sm:$0xff]  ;;  %v51_v28 = vpack.c.bf16 %v24_v25, %v23_v24  ;;  %v22_v33 = vld [vmem:[%s453_s0 + $0x38] sm:$0xff]  ;;  %v37_v34 = vld [vmem:[%s453_s0 + $0xb0] sm:$0xff] }
   0xb   :  { %v116_v23 = vsel %vm69_vm0, %v60_v21, 0  ;;  %v59_v29 = vpack.c.bf16 %v40_v27, %v39_v26  ;;  %v38_v35 = vld [vmem:[%s453_s0 + $0xb8] sm:$0xff]  ;;  %v50_v36 = vpack.c.bf16 %v22_v33, %v21_v32  ;;  %v19_v40 = vld [vmem:[%s453_s0 + $0x20] sm:$0xff]  ;;  %v20_v41 = vld [vmem:[%s453_s0 + $0x28] sm:$0xff] }
   0xc   :  { %v89_v30 = vsel %vm69_vm0, %v51_v28, 0  ;;  %v58_v37 = vpack.c.bf16 %v38_v35, %v37_v34  ;;  %v35_v42 = vld [vmem:[%s453_s0 + $0xa0] sm:$0xff]  ;;  %v36_v43 = vld [vmem:[%s453_s0 + $0xa8] sm:$0xff]  ;;  %v49_v44 = vpack.c.bf16 %v20_v41, %v19_v40  ;;  %v17_v48 = vld [vmem:[%s453_s0 + $0x10] sm:$0xff] }
   0xd   :  { %240 = vmatpush.bf16.xpose.msra.mxu2 %v95_v14  ;;  %125 = vmatpush.bf16.xpose.msra.mxu0 %v95_v14  ;;  %v113_v31 = vsel %vm69_vm0, %v59_v29, 0  ;;  %v86_v38 = vsel %vm69_vm0, %v50_v36, 0  ;;  %v57_v45 = vpack.c.bf16 %v36_v43, %v35_v42  ;;  %v18_v49 = vld [vmem:[%s453_s0 + $0x18] sm:$0xff]  ;;  %v33_v50 = vld [vmem:[%s453_s0 + $0x90] sm:$0xff]  ;;  %v15_v56 = vld [vmem:[%s453_s0] sm:$0xff] }
   0xe   :  { %248 = vmatpush.bf16.xpose.msra.mxu3 %v119_v15  ;;  %144 = vmatpush.bf16.xpose.msra.mxu1 %v119_v15  ;;  %v110_v39 = vsel %vm69_vm0, %v58_v37, 0  ;;  %v83_v46 = vsel %vm69_vm0, %v49_v44, 0  ;;  %v34_v51 = vld [vmem:[%s453_s0 + $0x98] sm:$0xff]  ;;  %v48_v52 = vpack.c.bf16 %v18_v49, %v17_v48  ;;  %v16_v57 = vld [vmem:[%s453_s0 + $0x8] sm:$0xff]  ;;  %v31_v58 = vld [vmem:[%s453_s0 + $0x80] sm:$0xff] }
   0xf   :  { %v107_v47 = vsel %vm69_vm0, %v57_v45, 0  ;;  %v56_v53 = vpack.c.bf16 %v34_v51, %v33_v50  ;;  %v32_v59 = vld [vmem:[%s453_s0 + $0x88] sm:$0xff]  ;;  %v47_v60 = vpack.c.bf16 %v16_v57, %v15_v56  ;;  %v65_v0 = vld [vmem:[%s454_s1 + $0x10] sm:$0xff]  ;;  %v66_v1 = vld [vmem:[%s454_s1 + $0x18] sm:$0xff] }
  0x10   :  { %v80_v54 = vsel %vm69_vm0, %v48_v52, 0  ;;  %v55_v61 = vpack.c.bf16 %v32_v59, %v31_v58  ;;  %v63_v2 = vld [vmem:[%s454_s1] sm:$0xff]  ;;  %v64_v3 = vld [vmem:[%s454_s1 + $0x8] sm:$0xff]  ;;  %v68_v4 = vpack.c.bf16 %v66_v1, %v65_v0 }
  0x11   :  { %v104_v55 = vsel %vm69_vm0, %v56_v53, 0  ;;  %v77_v62 = vsel %vm69_vm0, %v47_v60, 0  ;;  %v67_v5 = vpack.c.bf16 %v64_v3, %v63_v2  ;;  %v170_v20 = vld [vmem:[%s455_s2] sm:$0xff] }
  0x12   :  { %v101_v63 = vsel %vm69_vm0, %v55_v61, 0 }
  0x15   :  { %241 = vmatpush.bf16.xpose.msra.mxu2 %v92_v22  ;;  %126 = vmatpush.bf16.xpose.msra.mxu0 %v92_v22 }
  0x16   :  { %249 = vmatpush.bf16.xpose.msra.mxu3 %v116_v23  ;;  %145 = vmatpush.bf16.xpose.msra.mxu1 %v116_v23 }
  0x1d   :  { %242 = vmatpush.bf16.xpose.msra.mxu2 %v89_v30  ;;  %127 = vmatpush.bf16.xpose.msra.mxu0 %v89_v30 }
  0x1e   :  { %250 = vmatpush.bf16.xpose.msra.mxu3 %v113_v31  ;;  %146 = vmatpush.bf16.xpose.msra.mxu1 %v113_v31 }
  0x25   :  { %243 = vmatpush.bf16.xpose.msra.mxu2 %v86_v38  ;;  %128 = vmatpush.bf16.xpose.msra.mxu0 %v86_v38 }
  0x26   :  { %251 = vmatpush.bf16.xpose.msra.mxu3 %v110_v39  ;;  %147 = vmatpush.bf16.xpose.msra.mxu1 %v110_v39 }
  0x2d   :  { %244 = vmatpush.bf16.xpose.msra.mxu2 %v83_v46  ;;  %129 = vmatpush.bf16.xpose.msra.mxu0 %v83_v46 }
  0x2e   :  { %252 = vmatpush.bf16.xpose.msra.mxu3 %v107_v47  ;;  %148 = vmatpush.bf16.xpose.msra.mxu1 %v107_v47 }
  0x35   :  { %245 = vmatpush.bf16.xpose.msra.mxu2 %v80_v54  ;;  %130 = vmatpush.bf16.xpose.msra.mxu0 %v80_v54 }
  0x36   :  { %253 = vmatpush.bf16.xpose.msra.mxu3 %v104_v55  ;;  %149 = vmatpush.bf16.xpose.msra.mxu1 %v104_v55 }
  0x3d   :  { %246 = vmatpush.bf16.xpose.msra.mxu2 %v77_v62  ;;  %131 = vmatpush.bf16.xpose.msra.mxu0 %v77_v62 }
  0x3e   :  { %254 = vmatpush.bf16.xpose.msra.mxu3 %v101_v63  ;;  %150 = vmatpush.bf16.xpose.msra.mxu1 %v101_v63 }
  0x44   :  { %234 = vmatmul.msk.bf16.vlgmr.msra.gmra.mxu2 %vm69_vm0, %v68_v4  ;;  %233 = vmatmul.msk.bf16.vlgmr.msra.gmra.mxu0 %vm69_vm0, %v67_v5 }
  0x45   :  { %236 = vmatmul.msk.bf16.vlgmr.msra.gmra.mxu3 %vm69_vm0, %v68_v4  ;;  %235 = vmatmul.msk.bf16.vlgmr.msra.gmra.mxu1 %vm69_vm0, %v67_v5 }
  0xc1   :  { %v133_v6 = vpop.f32.mrf.mxu0 }
  0xc2   :  { %v152_v8 = vpop.f32.mrf.mxu1 }
  0xc7   :  { %v138_v7 = vpop.f32.mrf.mxu2 }
  0xc8   :  { %v157_v9 = vpop.f32.mrf.mxu3 }
  0xc9   :  { %v135_v12 = vpop.f32.mrf.mxu0 }
  0xca   :  { %v154_v13 = vpop.f32.mrf.mxu1 }
  0xcf   :  { %v140_v10 = vpop.f32.mrf.mxu2 }
  0xd0   :  { %256 = vtanh.f32 %v140_v10  ;;  %v159_v11 = vpop.f32.mrf.mxu3 }
  0xd1   :  { %258 = vtanh.f32 %v159_v11 }
  0xd2   :  { %260 = vtanh.f32 %v138_v7 }
  0xd3   :  { %262 = vtanh.f32 %v157_v9 }
  0xd4   :  { %264 = vtanh.f32 %v135_v12 }
  0xd5   :  { %266 = vtanh.f32 %v154_v13 }
  0xd6   :  { %v257_v14 = vpop.eup %256  ;;  %268 = vtanh.f32 %v133_v6 }
  0xd7   :  { %v259_v15 = vpop.eup %258  ;;  %270 = vtanh.f32 %v152_v8  ;;  %187 = vmatpush.msrb.mxu2 %v257_v14 }
  0xd8   :  { %v261_v16 = vpop.eup %260  ;;  %207 = vmatpush.msrb.mxu3 %v259_v15 }
  0xd9   :  { %v263_v17 = vpop.eup %262  ;;  %188 = vmatpush.msrb.mxu2 %v261_v16 }
  0xda   :  { %v265_v18 = vpop.eup %264  ;;  %208 = vmatpush.msrb.mxu3 %v263_v17 }
  0xdb   :  { %v267_v19 = vpop.eup %266  ;;  %189 = vmatpush.msrb.mxu2 %v265_v18 }
  0xdc   :  { %v269_v21 = vpop.eup %268  ;;  %209 = vmatpush.msrb.mxu3 %v267_v19 }
  0xdd   :  { %v271_v22 = vpop.eup %270  ;;  %190 = vmatpush.msrb.mxu2 %v269_v21 }
  0xde   :  { %210 = vmatpush.msrb.mxu3 %v271_v22  ;;  %237 = vmatmul.msk.f32.vlgmr.msrb.gmra.mxu2 %vm171_vm1, %v170_v20 }
  0xdf   :  { %238 = vmatmul.msk.f32.vlgmr.msrb.gmra.mxu3 %vm171_vm1, %v170_v20 }
 0x161   :  { %v192_v23 = vpop.f32.mrf.mxu2 }
 0x162   :  { %v212_v24 = vpop.f32.mrf.mxu3 }
 0x163   :  { %v215_v25 = vpack.c.bf16 %v212_v24, %v192_v23 }
 0x165   :  { %216 = vst [vmem:[#allocation2] sm:$0xff] %v215_v25 }
 0x166   :  { %227 = dma.vmem_to_hbm [thread:$0]  %s223_s4, 128, %s225_s7, [#allocation3]  }
 0x167   :  { %296 = dma.done.wait [#allocation3], 128  }
 0x168   :  { %297 = vsyncadd [#allocation3], 4294967168 }
 0x169   :  { %232 = vsyncpa [#allocation3], 1 }

</bundles_post_ra>
